<compile_context>
chip_gen: v6e
topology: v6e:2x2x1
jax: 0.10.0
libtpu: 0.0.40
codegen_flags: <defaults>
</compile_context>

<pallas_src>
import functools

import numpy as np
import jax
import jax.numpy as jnp
from jax.experimental import pallas as pl
from jax.experimental.pallas import tpu as pltpu


def _round_up(x, m):
    return (x + m - 1) // m * m


def _pick_tile(dim, preferred, align):
    """Pick a tile size for `dim`. Returns (tile, padded_dim).

    Small dims use the full extent (always legal). Large dims prefer an
    `align`-multiple tile that divides `dim` exactly (avoids a per-call
    jnp.pad that would re-materialize the weight in HBM); padding is only
    the fallback when no aligned divisor exists.
    """
    if dim <= preferred:
        return dim, dim
    t = (preferred // align) * align
    while t >= align:
        if dim % t == 0:
            return t, dim
        t -= align
    t = max((preferred // align) * align, align)
    return t, _round_up(dim, t)


def _dense_kernel_single(coef_ref, x_ref, w_ref, o_ref, *, mxu_dtype):
    """Single K step: direct write, no scratch, no init/finalize.

    coef_ref: (1,) f32 in SMEM
    x_ref:    (tm, K)
    w_ref:    (K, tn)   (in_features x out_features layout)
    o_ref:    (tm, tn)
    """
    a = x_ref[...]
    b = w_ref[...]
    if mxu_dtype is not None:
        a = a.astype(mxu_dtype)
        b = b.astype(mxu_dtype)
    acc = jnp.dot(a, b, preferred_element_type=jnp.float32)
    o_ref[...] = (acc * coef_ref[0]).astype(o_ref.dtype)


def _dense_kernel_acc(coef_ref, x_ref, w_ref, o_ref, acc_ref, *, mxu_dtype):
    """K tiled across the last grid axis: f32 VMEM accumulator carried."""
    @pl.when(pl.program_id(2) == 0)
    def _():
        acc_ref[...] = jnp.zeros_like(acc_ref)

    a = x_ref[...]
    b = w_ref[...]
    if mxu_dtype is not None:
        a = a.astype(mxu_dtype)
        b = b.astype(mxu_dtype)
    acc_ref[...] += jnp.dot(a, b, preferred_element_type=jnp.float32)

    @pl.when(pl.program_id(2) == pl.num_programs(2) - 1)
    def _():
        o_ref[...] = (acc_ref[...] * coef_ref[0]).astype(o_ref.dtype)


def dense_layer(x, weight, weight_coef=1.0, *, tm=512, tn=512, tk=1024,
                mxu_dtype=None):
    """JAX/Pallas equivalent of DenseLayer.forward (no bias).

    x:           (..., in_features)
    weight:      (out_features, in_features)   -- PyTorch parameter layout
    weight_coef: runtime equalized-LR coefficient (python float or traced scalar)
    mxu_dtype:   optional dtype (e.g. jnp.bfloat16) the matmul operands are cast
                 to inside the kernel; accumulation stays f32.
    Returns (..., out_features) in x.dtype.
    """
    in_features = x.shape[-1]
    out_features, k_w = weight.shape
    assert k_w == in_features, "weight/in_features mismatch"

    lead = x.shape[:-1]
    x2 = x.reshape(-1, in_features)
    M, K = x2.shape
    N = out_features

    # Kernel consumes the weight as (K, N): plain A@B contraction, lane-dense N.
    # TODO(synk): in a real model store the parameter pre-transposed so this
    # transpose is not executed per forward call.
    wt = jnp.swapaxes(weight, 0, 1)  # (K, N)

    tm_, Mp = _pick_tile(M, tm, 8)
    tn_, Np = _pick_tile(N, tn, 128)
    tk_, Kp = _pick_tile(K, tk, 128)

    # v7x has 2 TensorCores per chip: if the whole layer is one (M, N) block,
    # split N into two blocks so both cores get work (keep N a 128-multiple).
    if (Mp // tm_) * (Np // tn_) == 1 and tn_ % 256 == 0:
        tn_ //= 2

    if (Mp, Kp) != (M, K):
        x2 = jnp.pad(x2, ((0, Mp - M), (0, Kp - K)))
    if (Kp, Np) != (K, N):
        wt = jnp.pad(wt, ((0, Kp - K), (0, Np - N)))

    # Runtime coefficient as an SMEM scalar (traced-safe, no recompiles).
    coef = jnp.asarray(weight_coef, dtype=jnp.float32).reshape(1)

    nm, nn, nk = Mp // tm_, Np // tn_, Kp // tk_
    in_item = x2.dtype.itemsize
    w_item = wt.dtype.itemsize
    out_item = jnp.dtype(x.dtype).itemsize

    cost = pl.CostEstimate(
        flops=2 * Mp * Np * Kp,
        transcendentals=0,
        # x is re-read once per N block, the weight once per M block.
        bytes_accessed=(Mp * Kp * in_item * nn
                        + Kp * Np * w_item * nm
                        + Mp * Np * out_item),
    )

    # Double-buffered input/output tiles (+ f32 accumulator when K is tiled).
    vmem_need = 2 * (tm_ * tk_ * in_item + tk_ * tn_ * w_item
                     + tm_ * tn_ * out_item)
    if nk > 1:
        vmem_need += tm_ * tn_ * 4
    vmem_limit = max(vmem_need + (4 << 20), 32 << 20)

    coef_spec = pl.BlockSpec(memory_space=pltpu.MemorySpace.SMEM)

    if nk == 1:
        # Fast path: whole K in one tile -> no scratch, no reduction axis.
        grid_spec = pltpu.PrefetchScalarGridSpec(
            num_scalar_prefetch=0,
            grid=(nm, nn),
            in_specs=[
                coef_spec,
                pl.BlockSpec((tm_, Kp), lambda i, j: (i, 0)),   # x tile
                pl.BlockSpec((Kp, tn_), lambda i, j: (0, j)),   # weight tile
            ],
            out_specs=pl.BlockSpec((tm_, tn_), lambda i, j: (i, j)),
        )
        kernel = functools.partial(_dense_kernel_single, mxu_dtype=mxu_dtype)
        dims = ("parallel", "parallel")
    else:
        grid_spec = pltpu.PrefetchScalarGridSpec(
            num_scalar_prefetch=0,
            grid=(nm, nn, nk),
            in_specs=[
                coef_spec,
                pl.BlockSpec((tm_, tk_), lambda i, j, k: (i, k)),  # x tile
                pl.BlockSpec((tk_, tn_), lambda i, j, k: (k, j)),  # weight tile
            ],
            out_specs=pl.BlockSpec((tm_, tn_), lambda i, j, k: (i, j)),
            scratch_shapes=[pltpu.VMEM((tm_, tn_), jnp.float32)],
        )
        kernel = functools.partial(_dense_kernel_acc, mxu_dtype=mxu_dtype)
        dims = ("parallel", "parallel", "arbitrary")

    out = pl.pallas_call(
        kernel,
        out_shape=jax.ShapeDtypeStruct((Mp, Np), x.dtype),
        grid_spec=grid_spec,
        compiler_params=pltpu.CompilerParams(
            dimension_semantics=dims,
            vmem_limit_bytes=vmem_limit),
        cost_estimate=cost,
    )(coef, x2, wt)

    if (Mp, Np) != (M, N):
        out = out[:M, :N]
    return out.reshape(*lead, out_features)


if __name__ == "__main__":
    # DenseLayer(in_features=32, out_features=48, lr_mul=1, weight_scale=True, gain=1)
    in_features, out_features = 32, 48
    lr_mul, weight_scale, gain = 1.0, True, 1.0

    # _get_weight_and_coef, replicated host-side (parameter init is just data).
    fan_in = in_features
    he_std = gain / np.sqrt(fan_in)
    if weight_scale:
        init_std = 1.0 / lr_mul
        runtime_coef = he_std * lr_mul
    else:
        init_std = he_std / lr_mul
        runtime_coef = lr_mul

    key = jax.random.PRNGKey(0)
    kw, kx = jax.random.split(key)
    weight = (init_std *
              jax.random.normal(kw, (out_features, in_features), jnp.float32))
    # input: batch=2, seq=8, hidden=32  ->  matmul over the last dim
    x = jax.random.normal(kx, (2, 8, in_features), dtype=jnp.float32)

    # Pure-JAX reference: x @ (coef * W)^T
    ref = jnp.matmul(x, (runtime_coef * weight).T)

    # f32 MXU path (exact-ish): strict tolerance.
    out = dense_layer(x, weight, runtime_coef)
    jax.block_until_ready(out)
    np.testing.assert_allclose(np.asarray(out), np.asarray(ref),
                               rtol=1e-5, atol=1e-5)

    # bf16-fed MXU path (f32 accumulation): loose tolerance.
    out_bf16 = dense_layer(x, weight, runtime_coef, mxu_dtype=jnp.bfloat16)
    jax.block_until_ready(out_bf16)
    np.testing.assert_allclose(np.asarray(out_bf16), np.asarray(ref),
                               rtol=5e-2, atol=5e-2)

    print("KERNEL_OK")
</pallas_src>

<mosaic_0001>
module attributes {stable_mosaic.version = 11 : i64} {
  func.func @_dense_kernel_single(%arg0: i32, %arg1: i32, %arg2: memref<1xf32, #tpu.memory_space<smem>>, %arg3: memref<16x32xf32, #tpu.memory_space<vmem>>, %arg4: memref<32x48xf32, #tpu.memory_space<vmem>>, %arg5: memref<16x48xf32, #tpu.memory_space<vmem>>) attributes {dimension_semantics = [#tpu.dimension_semantics<parallel>, #tpu.dimension_semantics<parallel>], iteration_bounds = array<i64: 1, 1>, scalar_prefetch = 0 : i64, scratch_operands = 0 : i64, tpu.core_type = #tpu.core_type<tc>, window_params = [{transform_indices = @transform_0, window_bounds = array<i64: 1>}, {transform_indices = @transform_1, window_bounds = array<i64: 16, 32>}, {transform_indices = @transform_2, window_bounds = array<i64: 32, 48>}, {transform_indices = @transform_3, window_bounds = array<i64: 16, 48>}]} {
    %c0 = arith.constant 0 : index
    %c0_0 = arith.constant 0 : index
    %0 = vector.load %arg3[%c0, %c0_0] : memref<16x32xf32, #tpu.memory_space<vmem>>, vector<16x32xf32>
    %c0_1 = arith.constant 0 : index
    %c0_2 = arith.constant 0 : index
    %1 = vector.load %arg4[%c0_1, %c0_2] : memref<32x48xf32, #tpu.memory_space<vmem>>, vector<32x48xf32>
    %cst = arith.constant dense<0.000000e+00> : vector<16x48xf32>
    %2 = tpu.matmul %0, %1, %cst {dimension_numbers = #tpu.dot_dimension_numbers<[1], [0], [0], [1], [0, 0, 1, 1], [], []>} : vector<16x32xf32>, vector<32x48xf32>, vector<16x48xf32> -> vector<16x48xf32>
    %c0_3 = arith.constant 0 : index
    %3 = memref.load %arg2[%c0_3] : memref<1xf32, #tpu.memory_space<smem>>
    %4 = vector.broadcast %3 : f32 to vector<16x48xf32>
    %5 = arith.mulf %2, %4 : vector<16x48xf32>
    %c0_4 = arith.constant 0 : index
    %c0_5 = arith.constant 0 : index
    %6 = vector.load %arg5[%c0_4, %c0_5] : memref<16x48xf32, #tpu.memory_space<vmem>>, vector<16x48xf32>
    tpu.vector_store %arg5[%c0_4, %c0_5], %5 {strides = array<i32>} : memref<16x48xf32, #tpu.memory_space<vmem>>, vector<16x48xf32>,
    return
  }
  func.func @transform_0(%arg0: i32, %arg1: i32) -> i32 {
    %c0_i32 = arith.constant 0 : i32
    %c0_i32_0 = arith.constant 0 : i32
    return %c0_i32 : i32
  }
  func.func @transform_1(%arg0: i32, %arg1: i32) -> (i32, i32) {
    %c0_i32 = arith.constant 0 : i32
    %c0_i32_0 = arith.constant 0 : i32
    return %arg0, %c0_i32 : i32, i32
  }
  func.func @transform_2(%arg0: i32, %arg1: i32) -> (i32, i32) {
    %c0_i32 = arith.constant 0 : i32
    %c0_i32_0 = arith.constant 0 : i32
    return %c0_i32, %arg1 : i32, i32
  }
  func.func @transform_3(%arg0: i32, %arg1: i32) -> (i32, i32) {
    %c0_i32 = arith.constant 0 : i32
    return %arg0, %arg1 : i32, i32
  }
}

</mosaic_0001>

<bundles_post_ra>
// kernel: tpu_custom_call.1
= control target key start
LH: loop header
LB: loop body
LE: loop exit
PB: predicated region body
PF: predicated region fallthrough
CT: control target
= control target key end

     0   :  { %9 = vsyncpa [#allocation4], 0  ;;  %s295_s0 = inlined_call_operand.<no memory space> [shape: f32[1], index: 0, kind: input, shape index: {}]   ;;  %s296_s1 = inlined_call_operand.hbm [shape: f32[16,32], index: 1, kind: input, shape index: {}]   ;;  %s297_s2 = inlined_call_operand.hbm [shape: f32[32,48], index: 2, kind: input, shape index: {}]   ;;  %s298_s3 = inlined_call_operand.hbm [shape: f32[16,48], index: 3, kind: output, shape index: {}]  }
   0x1   :  { %10 = vsyncpa [#allocation7], 0 }
   0x2   :  { %11 = vsyncpa [#allocation5], 0  ;;  %s247_s12 = smov [#allocation3]  }
   0x3   :  { %s19_s13 = sshll.u32 %s247_s12, 4  ;;  %s20_s13 = int_to_ptr.vmem [resolvable:$true] %s19_s13 }
   0x4   :  { %s189_s14 = scalar_lea.vmem %s20_s13, 256  ;;  %p194_p1 = scmp.lt.s32.totalorder %s20_s13, %s20_s13 }
   0x5   :  { %p190_p0 = scmp.ne.s32.totalorder %s20_s13, %s189_s14  ;;  %p195_p2 = scmp.lt.s32.totalorder %s189_s14, %s189_s14 }
   0x7   :  { %p196_p3 = por %p195_p2, %p194_p1 }
   0x9   :  { %p197_p4 = pnand %p196_p3, %p190_p0 }
   0xb   :  { %200 = shalt.err (!%p197_p4)
}
   0xc   :  { %s248_s15 = smov 128   ;;  %s249_s16 = smov 8  }
   0xd   :  { %25 = dma.hbm_to_vmem [thread:$0]  %s296_s1, 256, %s20_s13, [#allocation4], %s248_s15, %s248_s15, %s249_s16  }
   0xe   :  { %s250_s19 = smov [#allocation6]  }
   0xf   :  { %s31_s20 = sshll.u32 %s250_s19, 4  ;;  %s32_s20 = int_to_ptr.vmem [resolvable:$true] %s31_s20 }
  0x10   :  { %s209_s21 = scalar_lea.vmem %s32_s20, 512  ;;  %p214_p6 = scmp.lt.s32.totalorder %s32_s20, %s32_s20 }
  0x11   :  { %p210_p5 = scmp.ne.s32.totalorder %s32_s20, %s209_s21  ;;  %p215_p7 = scmp.lt.s32.totalorder %s209_s21, %s209_s21 }
  0x13   :  { %p216_p8 = por %p215_p7, %p214_p6 }
  0x15   :  { %p217_p9 = pnand %p216_p8, %p210_p5 }
  0x17   :  { %220 = shalt.err (!%p217_p9)
}
  0x18   :  { %37 = dma.hbm_to_vmem [thread:$0]  %s297_s2, 512, %s32_s20, [#allocation7], %s248_s15, %s248_s15, %s249_s16  }
  0x19   :  { %241 = dma.done.wait [#allocation4], 256  }
  0x1a   :  { %242 = vsyncadd [#allocation4], 4294967040 }
  0x1b   :  { %243 = dma.done.wait [#allocation7], 512  }
  0x1c   :  { %244 = vsyncadd [#allocation7], 4294966784  ;;  %vm50_vm0 = vcmask 261120   ;;  %v49_v0 = vld [vmem:[#allocation6 + $0x18] sm:$0xff]  ;;  %v48_v1 = vld [vmem:[#allocation6 + $0x10] sm:$0xff]  ;;  %v133_v6 = vstv %s295_s0  ;;  %vm136_vm1 = vcmask 392192  }
  0x1d   :  { %165 = vmatprep.subr.mxu0 %v49_v0  ;;  %v44_v2 = vld [vmem:[#allocation3] sm:$0xff]  ;;  %v47_v3 = vld [vmem:[#allocation6 + $0x8] sm:$0xff]  ;;  %v46_v4 = vld [vmem:[#allocation6] sm:$0xff]  ;;  %s251_s24 = smov [#allocation8]  }
  0x1e   :  { %166 = vmatpush3.msra.mxu0 %v49_v0  ;;  %173 = vmatprep.mubr.msk.f32.mxu0 %vm50_vm0, %v44_v2  ;;  %v45_v5 = vld [vmem:[#allocation3 + $0x8] sm:$0xff]  ;;  %s144_s25 = sshll.u32 %s251_s24, 4  ;;  %s145_s25 = int_to_ptr.vmem [resolvable:$true] %s144_s25 }
  0x1f   :  { %167 = vmatprep.subr.mxu0 %v48_v1  ;;  %s221_s26 = scalar_lea.vmem %s145_s25, 256  ;;  %p226_p11 = scmp.lt.s32.totalorder %s145_s25, %s145_s25 }
  0x20   :  { %168 = vmatpush3.msra.mxu0 %v48_v1  ;;  %p222_p10 = scmp.ne.s32.totalorder %s145_s25, %s221_s26  ;;  %p227_p12 = scmp.lt.s32.totalorder %s221_s26, %s221_s26 }
  0x21   :  { %169 = vmatprep.subr.mxu0 %v47_v3 }
  0x22   :  { %170 = vmatpush3.msra.mxu0 %v47_v3  ;;  %p228_p13 = por %p227_p12, %p226_p11 }
  0x23   :  { %171 = vmatprep.subr.mxu0 %v46_v4 }
  0x24   :  { %172 = vmatpush3.msra.mxu0 %v46_v4  ;;  %p229_p0 = pnand %p228_p13, %p222_p10 }
  0x25   :  { %174 = vmatmul.mubr.msk.f32.vlgmr.msra.gmra.mxu0 %vm50_vm0, %v45_v5 }
  0xe5   :  { %v175_v7 = vpop.f32.mrf.mxu0 }
  0xe6   :  { %v135_v8 = vmul.f32 %v175_v7, %v133_v6 }
  0xe7   :  { %v123_v9 = vpop.f32.mrf.mxu0 }
  0xe8   :  { %v134_v10 = vmul.f32 %v133_v6, %v123_v9  ;;  %138 = vst.msk [vmem:[#allocation8 + $0x8] sm:$0xff] %vm136_vm1, %v135_v8 }
  0xea   :  { %137 = vst.msk [vmem:[#allocation8] sm:$0xff] %vm136_vm1, %v134_v10 }
  0xeb   :  { %232 = shalt.err (!%p229_p0)
}
  0xec   :  { %150 = dma.vmem_to_hbm [thread:$0]  %s145_s25, 256, %s298_s3, [#allocation5], %s248_s15, %s248_s15, %s249_s16  }
  0xed   :  { %245 = dma.done.wait [#allocation5], 256  }
  0xee   :  { %246 = vsyncadd [#allocation5], 4294967040 }
  0xef   :  { %154 = vsyncpa [#allocation4], 1 }
  0xf0   :  { %155 = vsyncpa [#allocation7], 1 }
  0xf1   :  { %156 = vsyncpa [#allocation5], 1 }

</bundles_post_ra>
